<compile_context>
chip_gen: v5e
topology: v5e:2x2
jax: 0.10.0
libtpu: 0.0.40
codegen_flags: <defaults>
</compile_context>

<pallas_src>
import jax
import jax.numpy as jnp
from jax.experimental import pallas as pl
from jax.experimental.pallas import tpu as pltpu

# ----------------------------- config (small, synthetic) -----------------------------
VOCAB = 256
HIDDEN = 64              # text hidden size
NUM_HEADS = 2
HEAD_DIM = 32
INTERMEDIATE = 128
NUM_LAYERS = 2
RMS_EPS = 1e-6
ROPE_BASE = 10000.0

CHANNELS = 3
IMG = 16
PATCH = 8
NUM_PATCHES = (IMG // PATCH) ** 2          # 4
V_HIDDEN = 32            # vision hidden size
V_HEADS = 2
V_HEAD_DIM = 16
V_INTER = 64
V_LAYERS = 2
LN_EPS = 1e-6

IMAGE_TOKEN_INDEX = VOCAB - 1
PAD_TOKEN_ID = -1

ACT_DTYPE = jnp.bfloat16     # residual-stream / activation dtype (halves HBM traffic)


# ----------------------------- fused linear kernel -----------------------------
def _make_fused_linear_kernel(norm, act, has_bias, has_residual, eps):
    """norm in {None,'rms','ln'}; act in {None,'gelu','geglu'} (geglu -> two weights)."""

    def kernel(*refs):
        refs = list(refs)
        x_ref = refs.pop(0)
        nw_ref = refs.pop(0) if norm is not None else None
        nb_ref = refs.pop(0) if norm == "ln" else None
        w_ref = refs.pop(0)
        w2_ref = refs.pop(0) if act == "geglu" else None
        b_ref = refs.pop(0) if has_bias else None
        r_ref = refs.pop(0) if has_residual else None
        o_ref = refs.pop(0)

        x = x_ref[...]
        if norm == "rms":
            xf = x.astype(jnp.float32)
            var = jnp.mean(xf * xf, axis=-1, keepdims=True)
            xf = xf * jax.lax.rsqrt(var + eps)
            x = xf * (1.0 + nw_ref[...].astype(jnp.float32))     # Gemma (1 + w)
        elif norm == "ln":
            xf = x.astype(jnp.float32)
            mu = jnp.mean(xf, axis=-1, keepdims=True)
            var = jnp.mean((xf - mu) ** 2, axis=-1, keepdims=True)
            x = (xf - mu) * jax.lax.rsqrt(var + eps) * nw_ref[...].astype(jnp.float32) \
                + nb_ref[...].astype(jnp.float32)

        xb = x.astype(jnp.bfloat16)
        acc = jnp.dot(xb, w_ref[...], preferred_element_type=jnp.float32)
        if has_bias:
            acc = acc + b_ref[...].astype(jnp.float32)
        if act == "geglu":
            up = jnp.dot(xb, w2_ref[...], preferred_element_type=jnp.float32)
            acc = jax.nn.gelu(acc, approximate=True) * up
        elif act == "gelu":
            acc = jax.nn.gelu(acc, approximate=True)
        if has_residual:
            acc = acc + r_ref[...].astype(jnp.float32)
        o_ref[...] = acc.astype(o_ref.dtype)

    return kernel


def fused_linear(x, w, *, w2=None, norm=None, norm_w=None, norm_b=None, bias=None,
                 residual=None, act=None, eps=1e-6, out_dtype=ACT_DTYPE, tn=256):
    """out = act(norm(x) @ w [, x @ w2]) (+ bias) (+ residual) as a single pallas_call.

    Tiled over N (parallel axis).  For act='geglu' the gate (w) and up (w2) weights are
    separate operands so N tiling stays enabled and the output tile is lane dense.
    M/K are small at these toy shapes and kept resident.
    TODO(synk): add K-tiling + VMEM f32 accumulator for production K (v7x 64 MiB VMEM).
    """
    M, K = x.shape
    N = w.shape[1]                      # per-branch width for geglu
    if N % tn != 0:                     # prefer 256-multiples (v6e/v7x MXU), then 128
        tn = 128 if N % 128 == 0 else N
    n_tiles = N // tn

    in_specs = [pl.BlockSpec((M, K), lambda j: (0, 0))]
    args = [x]
    if norm is not None:
        in_specs.append(pl.BlockSpec((1, K), lambda j: (0, 0)))
        args.append(norm_w.reshape(1, K))
        if norm == "ln":
            in_specs.append(pl.BlockSpec((1, K), lambda j: (0, 0)))
            args.append(norm_b.reshape(1, K))
    in_specs.append(pl.BlockSpec((K, tn), lambda j: (0, j)))
    args.append(w)
    if act == "geglu":
        in_specs.append(pl.BlockSpec((K, tn), lambda j: (0, j)))
        args.append(w2)
    if bias is not None:
        in_specs.append(pl.BlockSpec((1, tn), lambda j: (0, j)))
        args.append(bias.reshape(1, N))
    if residual is not None:
        in_specs.append(pl.BlockSpec((M, tn), lambda j: (0, j)))
        args.append(residual)

    kernel = _make_fused_linear_kernel(norm, act, bias is not None,
                                       residual is not None, eps)
    return pl.pallas_call(
        kernel,
        out_shape=jax.ShapeDtypeStruct((M, N), out_dtype),
        grid=(n_tiles,),
        in_specs=in_specs,
        out_specs=pl.BlockSpec((M, tn), lambda j: (0, j)),
        compiler_params=pltpu.CompilerParams(dimension_semantics=("parallel",)),
    )(*args)


# ----------------------------- standalone RMSNorm kernel -----------------------------
def _rms_kernel(x_ref, w_ref, o_ref):
    xf = x_ref[...].astype(jnp.float32)
    var = jnp.mean(xf * xf, axis=-1, keepdims=True)
    xf = xf * jax.lax.rsqrt(var + RMS_EPS)
    o_ref[...] = (xf * (1.0 + w_ref[...].astype(jnp.float32))).astype(o_ref.dtype)


def rms_norm(x, w, out_dtype=ACT_DTYPE):
    """Final Gemma RMSNorm, hoisted out of the N-tiled lm_head matmul."""
    M, K = x.shape
    return pl.pallas_call(
        _rms_kernel,
        out_shape=jax.ShapeDtypeStruct((M, K), out_dtype),
    )(x, w.reshape(1, K))


# ----------------------------- fused attention kernel -----------------------------
def _make_attn_kernel(causal):
    def kernel(q_ref, k_ref, v_ref, o_ref):
        # One head per grid step; refs are (1, S, D) blocks.  Scale is pre-folded into
        # the Q projection weights; RoPE is pre-applied in the wrapper.
        q = q_ref[0]                                   # (S, D) bf16
        k = k_ref[0]
        s = jax.lax.dot_general(q, k, (((1,), (1,)), ((), ())),
                                preferred_element_type=jnp.float32)   # (S, S) f32
        if causal:
            S = s.shape[0]
            row = jax.lax.broadcasted_iota(jnp.int32, (S, S), 0)
            col = jax.lax.broadcasted_iota(jnp.int32, (S, S), 1)
            s = jnp.where(col <= row, s, jnp.float32(-1e30))
        m = jnp.max(s, axis=-1, keepdims=True)
        p = jnp.exp(s - m)
        denom = jnp.sum(p, axis=-1, keepdims=True)
        p = p * pl.reciprocal(denom, approx=True)
        o = jnp.dot(p.astype(jnp.bfloat16), v_ref[0],
                    preferred_element_type=jnp.float32)
        o_ref[0] = o.astype(o_ref.dtype)

    return kernel


def _apply_rope(x, cos, sin):
    """x: (H, S, D); cos/sin: (S, D//2) f32.  rotate-half RoPE (commutes with Q scale)."""
    half = x.shape[-1] // 2
    x1, x2 = x[..., :half], x[..., half:]
    c, s = cos[None, :, :], sin[None, :, :]
    return jnp.concatenate([x1 * c - x2 * s, x2 * c + x1 * s], axis=-1)


def fused_attention(qkv, *, num_heads, head_dim, causal, cos=None, sin=None,
                    out_dtype=ACT_DTYPE):
    """qkv: (S, 3*num_heads*head_dim) -> (S, num_heads*head_dim).

    Head selection happens at the wrapper / BlockSpec level ((H, S, D) layout, heads as
    a "parallel" grid axis) so the kernel never slices at sub-128-lane offsets and every
    store is a full block.
    TODO(synk): production sequence lengths need KV-blocked online-softmax (flash) here.
    """
    S = qkv.shape[0]
    hd = num_heads * head_dim

    def split(off):
        return qkv[:, off:off + hd].reshape(S, num_heads, head_dim).transpose(1, 0, 2)

    q, k, v = split(0), split(hd), split(2 * hd)                  # (H, S, D) each
    if cos is not None:
        q = _apply_rope(q.astype(jnp.float32), cos, sin)
        k = _apply_rope(k.astype(jnp.float32), cos, sin)
    q = q.astype(jnp.bfloat16)
    k = k.astype(jnp.bfloat16)
    v = v.astype(jnp.bfloat16)

    out = pl.pallas_call(
        _make_attn_kernel(causal),
        out_shape=jax.ShapeDtypeStruct((num_heads, S, head_dim), out_dtype),
        grid=(num_heads,),
        in_specs=[pl.BlockSpec((1, S, head_dim), lambda h: (h, 0, 0))] * 3,
        out_specs=pl.BlockSpec((1, S, head_dim), lambda h: (h, 0, 0)),
        compiler_params=pltpu.CompilerParams(dimension_semantics=("parallel",)),
    )(q, k, v)
    return out.transpose(1, 0, 2).reshape(S, hd)


# ----------------------------- glue: RoPE tables -----------------------------
def rope_tables(position_ids, head_dim, base=ROPE_BASE):
    half = head_dim // 2
    inv_freq = 1.0 / (base ** (jnp.arange(half, dtype=jnp.float32) / half))
    freqs = position_ids.astype(jnp.float32)[:, None] * inv_freq[None, :]   # (S, half)
    return jnp.cos(freqs), jnp.sin(freqs)


# ----------------------------- parameter init -----------------------------
class PRNG:
    def __init__(self, key):
        self.key = key
        self.i = 0

    def normal(self, shape, scale=0.05):
        self.i += 1
        return scale * jax.random.normal(
            jax.random.fold_in(self.key, self.i), shape, dtype=jnp.float32
        )


def init_params(key):
    rng = PRNG(key)
    bf = lambda a: a.astype(jnp.bfloat16)
    params = {}

    # --- vision tower (SigLIP-style) ---
    conv_w = rng.normal((V_HIDDEN, CHANNELS, PATCH, PATCH))       # OIHW conv weight
    vision = {
        # conv (kernel == stride == patch) expressed as matmul: (C*P*P, V_HIDDEN)
        "patch_embed_w": bf(conv_w.reshape(V_HIDDEN, -1).T),
        "patch_embed_b": rng.normal((V_HIDDEN,)),
        "pos_embed": bf(rng.normal((NUM_PATCHES, V_HIDDEN))),
        "layers": [],
    }
    v_scale = V_HEAD_DIM ** -0.5
    for _ in range(V_LAYERS):
        q_w = rng.normal((V_HIDDEN, V_HEADS * V_HEAD_DIM))
        k_w = rng.normal((V_HIDDEN, V_HEADS * V_HEAD_DIM))
        v_w = rng.normal((V_HIDDEN, V_HEADS * V_HEAD_DIM))
        q_b = rng.normal((V_HEADS * V_HEAD_DIM,))
        k_b = rng.normal((V_HEADS * V_HEAD_DIM,))
        v_b = rng.normal((V_HEADS * V_HEAD_DIM,))
        vision["layers"].append({
            "ln1_w": 1.0 + rng.normal((V_HIDDEN,)),
            "ln1_b": rng.normal((V_HIDDEN,)),
            # softmax scale folded into Q weight + Q bias; merged QKV
            "qkv_w": bf(jnp.concatenate([q_w * v_scale, k_w, v_w], axis=1)),
            "qkv_b": jnp.concatenate([q_b * v_scale, k_b, v_b]),
            "o_w": bf(rng.normal((V_HEADS * V_HEAD_DIM, V_HIDDEN))),
            "o_b": rng.normal((V_HIDDEN,)),
            "ln2_w": 1.0 + rng.normal((V_HIDDEN,)),
            "ln2_b": rng.normal((V_HIDDEN,)),
            "fc1_w": bf(rng.normal((V_HIDDEN, V_INTER))),
            "fc1_b": rng.normal((V_INTER,)),
            "fc2_w": bf(rng.normal((V_INTER, V_HIDDEN))),
            "fc2_b": rng.normal((V_HIDDEN,)),
        })
    params["vision"] = vision

    # post_vision_tower_layernorm + multi_modal_projector.linear
    params["post_ln_w"] = 1.0 + rng.normal((V_HIDDEN,))
    params["post_ln_b"] = rng.normal((V_HIDDEN,))
    params["proj_w"] = bf(rng.normal((V_HIDDEN, HIDDEN)))
    params["proj_b"] = rng.normal((HIDDEN,))

    # --- text model (Gemma-style) ---
    embed_tokens = rng.normal((VOCAB, HIDDEN))
    text = {
        "embed_tokens": embed_tokens,
        "lm_head_w": bf(embed_tokens.T),          # tied lm_head
        "final_norm_w": rng.normal((HIDDEN,)),
        "layers": [],
    }
    t_scale = HEAD_DIM ** -0.5
    for _ in range(NUM_LAYERS):
        q_w = rng.normal((HIDDEN, NUM_HEADS * HEAD_DIM))
        k_w = rng.normal((HIDDEN, NUM_HEADS * HEAD_DIM))
        v_w = rng.normal((HIDDEN, NUM_HEADS * HEAD_DIM))
        text["layers"].append({
            "input_norm_w": rng.normal((HIDDEN,)),
            # softmax scale folded into Q weight; merged QKV
            "qkv_w": bf(jnp.concatenate([q_w * t_scale, k_w, v_w], axis=1)),
            "o_w": bf(rng.normal((NUM_HEADS * HEAD_DIM, HIDDEN))),
            "post_norm_w": rng.normal((HIDDEN,)),
            "gate_w": bf(rng.normal((HIDDEN, INTERMEDIATE))),   # separate gate / up so
            "up_w": bf(rng.normal((HIDDEN, INTERMEDIATE))),     # N tiling stays enabled
            "down_w": bf(rng.normal((INTERMEDIATE, HIDDEN))),
        })
    params["text"] = text
    return params


# ----------------------------- model pieces -----------------------------
def siglip_layer(lp, h):
    # LN1 + merged QKV projection (+bias) in one kernel
    qkv = fused_linear(h, lp["qkv_w"], norm="ln", norm_w=lp["ln1_w"],
                       norm_b=lp["ln1_b"], bias=lp["qkv_b"], eps=LN_EPS)
    attn = fused_attention(qkv, num_heads=V_HEADS, head_dim=V_HEAD_DIM, causal=False)
    # output projection + bias + residual in one kernel
    h = fused_linear(attn, lp["o_w"], bias=lp["o_b"], residual=h)
    # LN2 + fc1 + bias + gelu in one kernel
    inter = fused_linear(h, lp["fc1_w"], norm="ln", norm_w=lp["ln2_w"],
                         norm_b=lp["ln2_b"], bias=lp["fc1_b"], act="gelu", eps=LN_EPS)
    # fc2 + bias + residual in one kernel
    h = fused_linear(inter, lp["fc2_w"], bias=lp["fc2_b"], residual=h)
    return h


def vision_tower(vp, pixel_values):
    # pixel_values: NCHW (B, C, IMG, IMG)
    B, C, Hi, Wi = pixel_values.shape
    p = PATCH
    # non-overlapping patch extraction -> (B * num_patches, C*p*p)
    x = pixel_values.reshape(B, C, Hi // p, p, Wi // p, p)
    x = x.transpose(0, 2, 4, 1, 3, 5).reshape(B * (Hi // p) * (Wi // p), C * p * p)
    pos = jnp.tile(vp["pos_embed"], (B, 1))
    # patch-embed conv as matmul; bias + position-embedding add fused into the epilogue
    h = fused_linear(x.astype(jnp.bfloat16), vp["patch_embed_w"],
                     bias=vp["patch_embed_b"], residual=pos)
    for lp in vp["layers"]:
        h = siglip_layer(lp, h)
    return h


def get_vision_embeds(params, pixel_values, pixel_attention_mask=None,
                      image_sizes=None, image_grid_thw=None):
    last_hidden_state = vision_tower(params["vision"], pixel_values)
    # post_vision_tower_layernorm fused with multi_modal_projector.linear
    image_features = fused_linear(last_hidden_state, params["proj_w"],
                                  norm="ln", norm_w=params["post_ln_w"],
                                  norm_b=params["post_ln_b"],
                                  bias=params["proj_b"], eps=LN_EPS)
    return image_features.reshape(-1, image_features.shape[-1])


def get_inputs_embeds(params, input_ids, vision_embeds=None):
    inputs_embeds = jnp.take(params["text"]["embed_tokens"], input_ids,
                             axis=0).astype(ACT_DTYPE)
    if vision_embeds is not None:
        mask = input_ids == IMAGE_TOKEN_INDEX
        # equivalent of `inputs_embeds[mask] = vision_embeds` (in-order scatter)
        idx = jnp.cumsum(mask.astype(jnp.int32)) - 1
        idx = jnp.clip(idx, 0, vision_embeds.shape[0] - 1)
        inputs_embeds = jnp.where(mask[:, None],
                                  vision_embeds[idx].astype(ACT_DTYPE), inputs_embeds)
    return inputs_embeds


def gemma_layer(lp, h, cos, sin):
    # RMSNorm + merged QKV projection in one kernel
    qkv = fused_linear(h, lp["qkv_w"], norm="rms", norm_w=lp["input_norm_w"], eps=RMS_EPS)
    # causal softmax attention, heads on a parallel grid axis, RoPE/scale pre-applied
    attn = fused_attention(qkv, num_heads=NUM_HEADS, head_dim=HEAD_DIM,
                           causal=True, cos=cos, sin=sin)
    # output projection + residual in one kernel
    h = fused_linear(attn, lp["o_w"], residual=h)
    # RMSNorm + gate & up projections + GeGLU in one kernel (gate/up tiled separately)
    inter = fused_linear(h, lp["gate_w"], w2=lp["up_w"], norm="rms",
                         norm_w=lp["post_norm_w"], act="geglu", eps=RMS_EPS)
    # down projection + residual in one kernel
    h = fused_linear(inter, lp["down_w"], residual=h)
    return h


def text_model(tp, inputs_embeds, position_ids):
    # Gemma embedding normalizer
    h = (inputs_embeds.astype(jnp.float32) * (HIDDEN ** 0.5)).astype(ACT_DTYPE)
    cos, sin = rope_tables(position_ids, HEAD_DIM)
    for lp in tp["layers"]:
        h = gemma_layer(lp, h, cos, sin)
    # final RMSNorm applied after the lm_head_indices gather (per-token, so equivalent)
    return h


def forward(params, inputs_embeds, position_ids, cu_seqlen_prefill, kv_cache,
            slots, seqlen, hpu_attention_meta, lm_head_indices=None,
            attention_mask=None, adapter_data=None):
    if cu_seqlen_prefill is not None:
        position_ids = position_ids + 1
    hidden_states = text_model(params["text"], inputs_embeds, position_ids)
    if lm_head_indices is not None:
        hidden_states = hidden_states[lm_head_indices]
    # pad M up to a bf16 sublane-packing multiple (16) for the MXU LHS
    M = hidden_states.shape[0]
    pad = (-M) % 16
    if pad:
        hidden_states = jnp.pad(hidden_states, ((0, pad), (0, 0)))
    # final RMSNorm hoisted out of the N-tiled lm_head matmul (computed once, not per tile)
    normed = rms_norm(hidden_states, params["text"]["final_norm_w"])
    logits = fused_linear(normed, params["text"]["lm_head_w"], out_dtype=jnp.float32)
    if pad:
        logits = logits[:M]
    speculative_logits = None   # no speculator configured
    return logits, speculative_logits


# ----------------------------- main -----------------------------
if __name__ == "__main__":
    key = jax.random.PRNGKey(0)
    k_params, k_pix, k_ids = jax.random.split(key, 3)

    params = init_params(k_params)

    # inputs
    pixel_values = jax.random.normal(k_pix, (1, CHANNELS, IMG, IMG), dtype=jnp.float32)
    num_text_tokens = 8
    seq_len = NUM_PATCHES + num_text_tokens          # 4 image tokens + 8 text tokens = 12
    text_ids = jax.random.randint(k_ids, (num_text_tokens,), 0, VOCAB - 2, dtype=jnp.int32)
    input_ids = jnp.concatenate(
        [jnp.full((NUM_PATCHES,), IMAGE_TOKEN_INDEX, dtype=jnp.int32), text_ids]
    )
    position_ids = jnp.arange(seq_len, dtype=jnp.int32)
    cu_seqlen_prefill = jnp.array([0, seq_len], dtype=jnp.int32)
    lm_head_indices = jnp.array([seq_len - 1], dtype=jnp.int32)

    # multimodal pipeline
    vision_embeds = get_vision_embeds(params, pixel_values)
    inputs_embeds = get_inputs_embeds(params, input_ids, vision_embeds)

    logits, speculative_logits = forward(
        params,
        inputs_embeds=inputs_embeds,
        position_ids=position_ids,
        cu_seqlen_prefill=cu_seqlen_prefill,
        kv_cache=[],                 # TODO(synk): paged KV cache not modeled
        slots=None,
        seqlen=seq_len,
        hpu_attention_meta=None,
        lm_head_indices=lm_head_indices,
    )
    logits = jax.block_until_ready(logits)
    assert logits.shape == (1, VOCAB), logits.shape
    assert logits.dtype == jnp.float32
    assert speculative_logits is None
    assert bool(jnp.all(jnp.isfinite(logits)))
    print("KERNEL_OK")
</pallas_src>

<mosaic_0001>
module attributes {stable_mosaic.version = 11 : i64} {
  func.func @kernel(%arg0: i32, %arg1: memref<4x192xbf16, #tpu.memory_space<vmem>>, %arg2: memref<192x32xbf16, #tpu.memory_space<vmem>>, %arg3: memref<1x32xf32, #tpu.memory_space<vmem>>, %arg4: memref<4x32xbf16, #tpu.memory_space<vmem>>, %arg5: memref<4x32xbf16, #tpu.memory_space<vmem>>) attributes {dimension_semantics = [#tpu.dimension_semantics<parallel>], iteration_bounds = array<i64: 1>, scalar_prefetch = 0 : i64, scratch_operands = 0 : i64, tpu.core_type = #tpu.core_type<tc>, window_params = [{pipeline_mode = #tpu.pipeline_mode<synchronous>, transform_indices = @transform_0, window_bounds = array<i64: 4, 192>}, {transform_indices = @transform_1, window_bounds = array<i64: 192, 32>}, {transform_indices = @transform_2, window_bounds = array<i64: 1, 32>}, {transform_indices = @transform_3, window_bounds = array<i64: 4, 32>}, {transform_indices = @transform_4, window_bounds = array<i64: 4, 32>}]} {
    %c0 = arith.constant 0 : index
    %c0_0 = arith.constant 0 : index
    %0 = vector.load %arg1[%c0, %c0_0] : memref<4x192xbf16, #tpu.memory_space<vmem>>, vector<4x192xbf16>
    %c0_1 = arith.constant 0 : index
    %c0_2 = arith.constant 0 : index
    %1 = vector.load %arg2[%c0_1, %c0_2] : memref<192x32xbf16, #tpu.memory_space<vmem>>, vector<192x32xbf16>
    %cst = arith.constant dense<0.000000e+00> : vector<4x32xf32>
    %2 = tpu.matmul %0, %1, %cst {dimension_numbers = #tpu.dot_dimension_numbers<[1], [0], [0], [1], [0, 0, 1, 1], [], []>} : vector<4x192xbf16>, vector<192x32xbf16>, vector<4x32xf32> -> vector<4x32xf32>
    %c0_3 = arith.constant 0 : index
    %c0_4 = arith.constant 0 : index
    %3 = vector.load %arg3[%c0_3, %c0_4] : memref<1x32xf32, #tpu.memory_space<vmem>>, vector<1x32xf32>
    %4 = vector.broadcast %3 : vector<1x32xf32> to vector<4x32xf32>
    %5 = arith.addf %2, %4 : vector<4x32xf32>
    %c0_5 = arith.constant 0 : index
    %c0_6 = arith.constant 0 : index
    %6 = vector.load %arg4[%c0_5, %c0_6] : memref<4x32xbf16, #tpu.memory_space<vmem>>, vector<4x32xbf16>
    %7 = arith.extf %6 : vector<4x32xbf16> to vector<4x32xf32>
    %8 = arith.addf %5, %7 : vector<4x32xf32>
    %9 = arith.truncf %8 : vector<4x32xf32> to vector<4x32xbf16>
    %c0_7 = arith.constant 0 : index
    %c0_8 = arith.constant 0 : index
    %10 = vector.load %arg5[%c0_7, %c0_8] : memref<4x32xbf16, #tpu.memory_space<vmem>>, vector<4x32xbf16>
    tpu.vector_store %arg5[%c0_7, %c0_8], %9 {strides = array<i32>} : memref<4x32xbf16, #tpu.memory_space<vmem>>, vector<4x32xbf16>,
    return
  }
  func.func @transform_0(%arg0: i32) -> (i32, i32) {
    %c0_i32 = arith.constant 0 : i32
    %c0_i32_0 = arith.constant 0 : i32
    %c0_i32_1 = arith.constant 0 : i32
    return %c0_i32, %c0_i32_0 : i32, i32
  }
  func.func @transform_1(%arg0: i32) -> (i32, i32) {
    %c0_i32 = arith.constant 0 : i32
    %c0_i32_0 = arith.constant 0 : i32
    return %c0_i32, %arg0 : i32, i32
  }
  func.func @transform_2(%arg0: i32) -> (i32, i32) {
    %c0_i32 = arith.constant 0 : i32
    %c0_i32_0 = arith.constant 0 : i32
    return %c0_i32, %arg0 : i32, i32
  }
  func.func @transform_3(%arg0: i32) -> (i32, i32) {
    %c0_i32 = arith.constant 0 : i32
    %c0_i32_0 = arith.constant 0 : i32
    return %c0_i32, %arg0 : i32, i32
  }
  func.func @transform_4(%arg0: i32) -> (i32, i32) {
    %c0_i32 = arith.constant 0 : i32
    %c0_i32_0 = arith.constant 0 : i32
    return %c0_i32, %arg0 : i32, i32
  }
}

</mosaic_0001>

<bundles_post_ra>
// kernel: tpu_custom_call.1
= control target key start
LH: loop header
LB: loop body
LE: loop exit
PB: predicated region body
PF: predicated region fallthrough
CT: control target
= control target key end

     0   :  { %s339_s0 = inlined_call_operand.vmem [shape: bf16[4,192], index: 0, kind: input, shape index: {}]   ;;  %s340_s1 = inlined_call_operand.vmem [shape: bf16[192,32], index: 1, kind: input, shape index: {}]   ;;  %s341_s2 = inlined_call_operand.vmem [shape: f32[1,32], index: 2, kind: input, shape index: {}]   ;;  %s342_s3 = inlined_call_operand.vmem [shape: bf16[4,32], index: 3, kind: input, shape index: {}]   ;;  %s343_s4 = inlined_call_operand.hbm [shape: bf16[4,32], index: 4, kind: output, shape index: {}]  }
   0x1   :  { %v232_v0 = vld [vmem:[%s340_s1 + $0x38] sm:$0xff]  ;;  %v231_v2 = vld [vmem:[%s340_s1 + $0x30] sm:$0xff]  ;;  %v19_v4 = vld [vmem:[%s339_s0] sm:$0xf] }
   0x2   :  { %v236_v1 = vld [vmem:[%s340_s1 + $0x58] sm:$0xff]  ;;  %128 = vmatpush.bf16.msra.mxu0 %v232_v0  ;;  %v235_v3 = vld [vmem:[%s340_s1 + $0x50] sm:$0xff]  ;;  %49 = vst [vmem:[#allocation1] ss:$4 sm:$0xff] %v19_v4 }
   0x3   :  { %145 = vmatpush.bf16.msra.mxu1 %v236_v1 }
   0x4   :  { %9 = vsyncpa [#allocation3], 0  ;;  %v230_v5 = vld [vmem:[%s340_s1 + $0x28] sm:$0xff]  ;;  %v229_v7 = vld [vmem:[%s340_s1 + $0x20] sm:$0xff]  ;;  %vm125_vm0 = vcmask 523264   ;;  %s265_s18 = smov [#allocation2]  }
   0x5   :  { %v234_v6 = vld [vmem:[%s340_s1 + $0x48] sm:$0xff]  ;;  %v233_v8 = vld [vmem:[%s340_s1 + $0x40] sm:$0xff]  ;;  %v228_v9 = vld [vmem:[%s340_s1 + $0x18] sm:$0xff]  ;;  %s165_s19 = sshll.u32 %s265_s18, 4  ;;  %s167_s21 = sshll.u32 %s343_s4, 4  ;;  %vm158_vm1 = vcmask 254976   ;;  %s166_s19 = int_to_ptr.vmem [resolvable:$true] %s165_s19  ;;  %s168_s21 = int_to_ptr.hbm [resolvable:$true] %s167_s21 }
   0x6   :  { %129 = vmatpush.bf16.msra.mxu0 %v231_v2  ;;  %v227_v11 = vld [vmem:[%s340_s1 + $0x10] sm:$0xff]  ;;  %v226_v12 = vld [vmem:[%s340_s1 + $0x8] sm:$0xff]  ;;  %v225_v13 = vld [vmem:[%s340_s1] sm:$0xff] }
   0x7   :  { %146 = vmatpush.bf16.msra.mxu1 %v235_v3  ;;  %v238_v17 = vld [vmem:[%s341_s2] ss:$0 sm:$0xff] }
   0x8   :  { %v154_v18 = vld [vmem:[%s342_s3] sm:$0x3] }
   0x9   :  { %v51_v10 = vld.sshfl [vmem:[#allocation1 + $0x8] sm:$0xff pattern:$0x73625140]  ;;  %v50_v14 = vld.sshfl [vmem:[#allocation1] sm:$0xff pattern:$0x73625140]  ;;  %v155_v21 = vunpack.c.l.bf16 %v154_v18 }
   0xa   :  { %130 = vmatpush.bf16.msra.mxu0 %v230_v5 }
   0xb   :  { %147 = vmatpush.bf16.msra.mxu1 %v234_v6 }
   0xe   :  { %131 = vmatpush.bf16.msra.mxu0 %v229_v7 }
   0xf   :  { %148 = vmatpush.bf16.msra.mxu1 %v233_v8 }
  0x12   :  { %132 = vmatpush.bf16.msra.mxu0 %v228_v9  ;;  %224 = vmatmul.msk.bf16.vlgmr.msra.gmra.mxu1 %vm125_vm0, %v51_v10 }
  0x16   :  { %133 = vmatpush.bf16.msra.mxu0 %v227_v11 }
  0x1a   :  { %134 = vmatpush.bf16.msra.mxu0 %v226_v12 }
  0x1e   :  { %135 = vmatpush.bf16.msra.mxu0 %v225_v13 }
  0x21   :  { %136 = vmatmul.bf16.vlgmr.msra.gmra.mxu0 %v50_v14 }
  0x8f   :  { %v150_v15 = vpop.f32.mrf.mxu1 }
  0x97   :  { %v152_v16 = vpop.f32.mrf.mxu1 }
  0x9e   :  { %v137_v19 = vpop.f32.mrf.mxu0 }
  0x9f   :  { %v138_v20 = vadd.f32 %v238_v17, %v137_v19 }
  0xa1   :  { %v151_v22 = vadd.f32 %v150_v15, %v138_v20 }
  0xa3   :  { %v156_v23 = vadd.f32 %v155_v21, %v151_v22 }
  0xa5   :  { %v157_v24 = vpack.c.bf16 %v156_v23, %v156_v23 }
  0xa6   :  { %v139_v25 = vpop.f32.mrf.mxu0 }
  0xa7   :  { %159 = vst.msk [vmem:[#allocation2] sm:$0x3] %vm158_vm1, %v157_v24 }
  0xa8   :  { %170 = dma.vmem_to_hbm [thread:$0]  %s166_s19, 32, %s168_s21, [#allocation3]  }
  0xa9   :  { %263 = dma.done.wait [#allocation3], 32  }
  0xaa   :  { %264 = vsyncadd [#allocation3], 4294967264 }
  0xab   :  { %175 = vsyncpa [#allocation3], 1 }

</bundles_post_ra>
